<compile_context>
chip_gen: v7x
topology: tpu7x:2x2x1
jax: 0.10.0
libtpu: 0.0.40
codegen_flags: <defaults>
</compile_context>

<pallas_src>
import math

import jax
import jax.numpy as jnp
from jax import lax
from jax.experimental import pallas as pl
from jax.experimental.pallas import tpu as pltpu

NEG_INF = -1e30


# -----------------------------------------------------------------------------
# Pallas kernel: one (batch-block, q-tile, k-tile) step of dual-masked
# exp-kernel attention with online softmax + fused decoder.
# -----------------------------------------------------------------------------
def _attn_flash_kernel(q_ref, k_ref, v_ref, m_ref, wbd_ref, bcat_ref,
                       out_ref, m_sc, l_sc, acc_sc):
    """
    q_ref/k_ref/v_ref : (Bb, tq|tk, H)  bf16
    m_ref             : (Bb, 1, tk)     f32   (1.0 == invalid key)
    wbd_ref           : (2H, 2D)        bf16  block-diag [Wi 0; 0 We]
    bcat_ref          : (1, 1, 2D)      f32   [bi | be]
    out_ref           : (Bb, tq, 2D)    f32   packed [interp | extrap]
    scratch: m_sc (Bb,tq,1), l_sc (Bb,2tq,1), acc_sc (Bb,2tq,H)   all f32
    """
    qi = pl.program_id(1)
    ki = pl.program_id(2)
    n_k = pl.num_programs(2)

    Bb, tq, H = q_ref.shape
    tk = k_ref.shape[1]
    D2 = out_ref.shape[2]

    @pl.when(ki == 0)
    def _():
        m_sc[...] = jnp.full_like(m_sc, NEG_INF)
        l_sc[...] = jnp.zeros_like(l_sc)
        acc_sc[...] = jnp.zeros_like(acc_sc)

    q = q_ref[...]                                   # bf16
    k = k_ref[...]
    v = v_ref[...]
    invalid = m_ref[...] > 0.5                       # (Bb, 1, tk)

    scale = jnp.float32(1.0 / math.sqrt(H))
    # QK^T on the MXU (bf16 operands, f32 accumulation)
    s = jnp.einsum('bqh,bkh->bqk', q, k,
                   preferred_element_type=jnp.float32) * scale
    s = jnp.where(invalid, NEG_INF, s)               # invalid keys never win the max

    q_pos = qi * tq + lax.broadcasted_iota(jnp.int32, (tq, tk), 0)
    k_pos = ki * tk + lax.broadcasted_iota(jnp.int32, (tq, tk), 1)
    self_mask = (k_pos == q_pos)[None]               # (1, tq, tk)
    future_mask = (k_pos > q_pos)[None]

    # --- online softmax, shared running max / single exp for both patterns ---
    m_prev = m_sc[...]
    m_new = jnp.maximum(m_prev, jnp.max(s, axis=-1, keepdims=True))
    alpha = jnp.exp(m_prev - m_new)                  # (Bb, tq, 1)
    e = jnp.exp(s - m_new)                           # the ONLY large exp (EUP)

    # build both numerators by cheap VPU masking after the exp
    e_i = jnp.where(jnp.logical_or(invalid, self_mask), 0.0, e)     # interp
    e_e = jnp.where(jnp.logical_or(invalid, future_mask), 0.0, e)   # extrap
    e_all = jnp.concatenate([e_i, e_e], axis=1)      # (Bb, 2tq, tk)
    alpha2 = jnp.concatenate([alpha, alpha], axis=1)

    l_sc[...] = alpha2 * l_sc[...] + jnp.sum(e_all, axis=-1, keepdims=True)
    # stacked PV: one MXU sequence per batch element for interp + extrap
    acc_sc[...] = alpha2 * acc_sc[...] + jnp.einsum(
        'bqk,bkh->bqh', e_all.astype(v.dtype), v,
        preferred_element_type=jnp.float32)
    m_sc[...] = m_new

    @pl.when(ki == n_k - 1)
    def _():
        l = l_sc[...]
        l = jnp.where(l <= 0.0, 1.0, l)              # fully-masked rows -> zeros
        h = acc_sc[...] * pl.reciprocal(l, approx=True)    # (Bb, 2tq, H)
        # fused decoder: [h_i | h_e] @ blkdiag(Wi, We) -> [interp | extrap]
        hcat = jnp.concatenate([h[:, :tq, :], h[:, tq:, :]], axis=-1)  # (Bb,tq,2H)
        h2 = hcat.reshape(Bb * tq, 2 * H).astype(wbd_ref.dtype)
        dec = jnp.dot(h2, wbd_ref[...], preferred_element_type=jnp.float32)
        out_ref[...] = dec.reshape(Bb, tq, D2) + bcat_ref[...]


def attn_block_pallas(q, k, v, mask_f, Wi, bi, We, be):
    """q,k,v: (B,T,H) f32; mask_f: (B,T) f32 (1=invalid). Returns interp, extrap (B,T,D) f32."""
    B, T, H = q.shape
    D = Wi.shape[1]

    # ---- tile selection: bounds VMEM to O(tq*tk) on every generation ----
    if T <= 128:
        T_pad = ((T + 7) // 8) * 8
        tq = tk = T_pad
    else:
        tq = tk = 128
        T_pad = pl.cdiv(T, 128) * 128

    # ---- batch blocking: amortize per-grid-step overhead ----
    Bb = 1
    for cand in (8, 4, 2, 1):
        if B % cand == 0:
            Bb = cand
            break

    pad_t = T_pad - T
    if pad_t:
        q = jnp.pad(q, ((0, 0), (0, pad_t), (0, 0)))
        k = jnp.pad(k, ((0, 0), (0, pad_t), (0, 0)))
        v = jnp.pad(v, ((0, 0), (0, pad_t), (0, 0)))
        mask_f = jnp.pad(mask_f, ((0, 0), (0, pad_t)), constant_values=1.0)

    # bf16 operands: native MXU datapath and half the q/k/v HBM traffic.
    qb = q.astype(jnp.bfloat16)
    kb = k.astype(jnp.bfloat16)
    vb = v.astype(jnp.bfloat16)
    mask3 = mask_f.reshape(B, 1, T_pad).astype(jnp.float32)

    # Fused block-diagonal decoder weight + concatenated bias.
    Wbd = jnp.zeros((2 * H, 2 * D), jnp.float32)
    Wbd = Wbd.at[:H, :D].set(Wi).at[H:, D:].set(We).astype(jnp.bfloat16)
    bcat = jnp.concatenate([bi, be]).reshape(1, 1, 2 * D).astype(jnp.float32)

    grid = (B // Bb, T_pad // tq, T_pad // tk)
    grid_spec = pltpu.PrefetchScalarGridSpec(
        num_scalar_prefetch=0,
        grid=grid,
        in_specs=[
            pl.BlockSpec((Bb, tq, H), lambda b, qi, ki: (b, qi, 0)),     # q
            pl.BlockSpec((Bb, tk, H), lambda b, qi, ki: (b, ki, 0)),     # k
            pl.BlockSpec((Bb, tk, H), lambda b, qi, ki: (b, ki, 0)),     # v
            pl.BlockSpec((Bb, 1, tk), lambda b, qi, ki: (b, 0, ki)),     # key mask
            pl.BlockSpec((2 * H, 2 * D), lambda b, qi, ki: (0, 0)),      # Wbd
            pl.BlockSpec((1, 1, 2 * D), lambda b, qi, ki: (0, 0, 0)),    # bcat
        ],
        out_specs=pl.BlockSpec((Bb, tq, 2 * D), lambda b, qi, ki: (b, qi, 0)),
        scratch_shapes=[
            pltpu.VMEM((Bb, tq, 1), jnp.float32),        # running max (shared)
            pltpu.VMEM((Bb, 2 * tq, 1), jnp.float32),    # running denom [interp;extrap]
            pltpu.VMEM((Bb, 2 * tq, H), jnp.float32),    # running numerator
        ],
    )
    out = pl.pallas_call(
        _attn_flash_kernel,
        out_shape=jax.ShapeDtypeStruct((B, T_pad, 2 * D), jnp.float32),
        grid_spec=grid_spec,
        compiler_params=pltpu.CompilerParams(
            dimension_semantics=("parallel", "parallel", "arbitrary")),
    )(qb, kb, vb, mask3, Wbd, bcat)

    interp = out[:, :T, :D]
    extrap = out[:, :T, D:]
    return interp, extrap


# -----------------------------------------------------------------------------
# Pure-JAX reference for the fused block (same masking / bf16-at-dot semantics)
# -----------------------------------------------------------------------------
def attn_block_reference(q, k, v, mask_f, Wi, bi, We, be):
    B, T, H = q.shape
    scale = 1.0 / math.sqrt(H)
    qb, kb, vb = (x.astype(jnp.bfloat16) for x in (q, k, v))
    s = jnp.einsum('bqh,bkh->bqk', qb, kb,
                   preferred_element_type=jnp.float32) * scale
    inv = (mask_f > 0.5)[:, None, :]
    s = jnp.where(inv, NEG_INF, s)
    idx = jnp.arange(T)
    self_m = (idx[None, :] == idx[:, None])[None]
    fut_m = (idx[None, :] > idx[:, None])[None]
    m = jnp.max(s, axis=-1, keepdims=True)
    e = jnp.exp(s - m)
    e_i = jnp.where(jnp.logical_or(inv, self_m), 0.0, e)
    e_e = jnp.where(jnp.logical_or(inv, fut_m), 0.0, e)

    def _attend(ev):
        l = jnp.sum(ev, axis=-1, keepdims=True)
        l = jnp.where(l <= 0.0, 1.0, l)
        num = jnp.einsum('bqk,bkh->bqh', ev.astype(jnp.bfloat16), vb,
                         preferred_element_type=jnp.float32)
        return num / l

    h_i, h_e = _attend(e_i), _attend(e_e)
    interp = jnp.einsum('bqh,hd->bqd', h_i.astype(jnp.bfloat16),
                        Wi.astype(jnp.bfloat16),
                        preferred_element_type=jnp.float32) + bi
    extrap = jnp.einsum('bqh,hd->bqd', h_e.astype(jnp.bfloat16),
                        We.astype(jnp.bfloat16),
                        preferred_element_type=jnp.float32) + be
    return interp, extrap


# -----------------------------------------------------------------------------
# Encoder (causal conv casts) — JAX glue feeding the Pallas kernel
# -----------------------------------------------------------------------------
def causal_conv(x, W, b):
    """x: (B, T, Cin); W: (w, Cin, Cout); causal over time (left padding)."""
    w = W.shape[0]
    x_pad = jnp.pad(x, ((0, 0), (w - 1, 0), (0, 0)))
    y = lax.conv_general_dilated(
        x_pad, W, window_strides=(1,), padding="VALID",
        dimension_numbers=("NWC", "WIO", "NWC"))
    return y + b


def attention_block(data, feats, mask_f, p):
    """One AttentionBlock: encoder casts -> fused Pallas attention + decoder."""
    x = data if feats is None else jnp.concatenate([data, feats], axis=-1)
    q = causal_conv(x, p["Wq"], p["bq"])
    k = causal_conv(x, p["Wk"], p["bk"])
    v = causal_conv(x, p["Wv"], p["bv"])
    return attn_block_pallas(q, k, v, mask_f,
                             p["Wi"], p["bi"], p["We"], p["be"])


# -----------------------------------------------------------------------------
# AttentionEstimator._step / _rollout (training branch) / forward
# -----------------------------------------------------------------------------
def estimator_step(params, data, feats, mask):
    B, T, Dd = data.shape
    mask_f = (jnp.zeros((B, T), jnp.float32) if mask is None
              else mask.astype(jnp.float32))
    cumsum = jnp.zeros_like(data)
    cur = data
    residue, forecast = [], []
    for p in params:                       # layer loop (n_layer blocks)
        interp, extrap = attention_block(cur, feats, mask_f, p)
        cur = cur - interp
        cumsum = cumsum + extrap
        residue.append(cur)
        forecast.append(cumsum)
    residue = jnp.stack(residue, axis=2)   # (B, T, n_layer, d_data)
    forecast = jnp.stack(forecast, axis=2)
    return residue, forecast


def attention_estimator_forward(params, data, feats, nan_mask, length,
                                horizon_cfg, training=True):
    B, T, Dd = data.shape

    # ---- mask construction (matches PyTorch forward exactly) ----
    if length is None:
        pad_mask = None
    else:
        pad_mask = jnp.arange(T, 0, -1)[None, :] > length[:, None]
    if pad_mask is None and nan_mask is None:
        mask = None
    else:
        if pad_mask is None:
            pad_mask = jnp.zeros_like(nan_mask)
        if nan_mask is None:
            nan_mask = jnp.zeros_like(pad_mask)
        mask = jnp.logical_or(pad_mask, nan_mask)

    # ---- horizon handling ----
    if isinstance(horizon_cfg, int):
        horizon = jnp.ones((B,), jnp.int32) * horizon_cfg
    elif length is None:
        horizon = jnp.ones((B,), jnp.int32) * int(T * horizon_cfg)
    else:
        horizon = (length.astype(jnp.float32) * horizon_cfg).astype(jnp.int32)
    max_horizon = int(jax.device_get(jnp.max(horizon)))

    if not training:
        # TODO(synk): eval-mode autoregressive rollout (growing sequence loop)
        raise NotImplementedError("eval-mode rollout not implemented")

    # ---- training branch ----
    target = data[:, T - max_horizon:T]
    if mask is not None:
        bc_mask = mask
        fc_mask = jnp.arange(max_horizon, 0, -1)[None, :] > horizon[:, None]
        fc_mask = jnp.logical_or(fc_mask, mask[:, T - max_horizon:T])
    else:
        bc_mask = fc_mask = None

    # _rollout (training): prefix feats, single _step, no AR loop
    prefix_feats = feats[:, :T] if feats is not None else None
    residue, forecast = estimator_step(params, data, prefix_feats, bc_mask)
    forecast = forecast[:, -(max_horizon + 1):-1]

    return residue, forecast, target, bc_mask, fc_mask


# -----------------------------------------------------------------------------
# Deterministic parameter init (synthetic weights; shapes from module config)
# -----------------------------------------------------------------------------
def init_params(key, n_layer, d_in, d_hidden, d_data, window):
    params = []
    for layer in range(n_layer):
        kl = jax.random.fold_in(key, layer)
        ks = jax.random.split(kl, 10)
        cs = 1.0 / math.sqrt(window * d_in)
        ds = 1.0 / math.sqrt(d_hidden)
        params.append(dict(
            Wq=jax.random.normal(ks[0], (window, d_in, d_hidden), jnp.float32) * cs,
            bq=jax.random.normal(ks[1], (d_hidden,), jnp.float32) * 0.01,
            Wk=jax.random.normal(ks[2], (window, d_in, d_hidden), jnp.float32) * cs,
            bk=jax.random.normal(ks[3], (d_hidden,), jnp.float32) * 0.01,
            Wv=jax.random.normal(ks[4], (window, d_in, d_hidden), jnp.float32) * cs,
            bv=jax.random.normal(ks[5], (d_hidden,), jnp.float32) * 0.01,
            Wi=jax.random.normal(ks[6], (d_hidden, d_data), jnp.float32) * ds,
            bi=jax.random.normal(ks[7], (d_data,), jnp.float32) * 0.01,
            We=jax.random.normal(ks[8], (d_hidden, d_data), jnp.float32) * ds,
            be=jax.random.normal(ks[9], (d_data,), jnp.float32) * 0.01,
        ))
    return params


if __name__ == "__main__":
    # small config consistent with AttentionEstimator.from_configs
    B, T = 2, 16
    d_data, d_feats, d_hidden = 4, 3, 32
    n_layer, window, horizon = 2, 3, 4

    key = jax.random.PRNGKey(0)
    kd, kf, km = jax.random.split(key, 3)
    data = jax.random.normal(kd, (B, T, d_data), jnp.float32)
    feats = jax.random.normal(kf, (B, T, d_feats), jnp.float32)
    nan_mask = jax.random.uniform(km, (B, T)) < 0.1
    length = jnp.array([16, 12], jnp.int32)

    params = init_params(jax.random.PRNGKey(0), n_layer,
                         d_data + d_feats, d_hidden, d_data, window)

    residue, forecast, target, bc_mask, fc_mask = attention_estimator_forward(
        params, data, feats, nan_mask, length, horizon, training=True)

    jax.block_until_ready(residue)
    jax.block_until_ready(forecast)

    assert residue.shape == (B, T, n_layer, d_data)
    assert forecast.shape == (B, horizon, n_layer, d_data)
    assert target.shape == (B, horizon, d_data)
    assert bool(jnp.all(jnp.isfinite(residue)))
    assert bool(jnp.all(jnp.isfinite(forecast)))

    # ---- kernel vs pure-JAX reference: single-tile (T=16) and tiled (T=256) ----
    for Tc in (16, 256):
        kt = jax.random.fold_in(key, Tc)
        k1, k2, k3, k4, k5 = jax.random.split(kt, 5)
        qc = jax.random.normal(k1, (B, Tc, d_hidden), jnp.float32)
        kc = jax.random.normal(k2, (B, Tc, d_hidden), jnp.float32)
        vc = jax.random.normal(k3, (B, Tc, d_hidden), jnp.float32)
        mc = (jax.random.uniform(k4, (B, Tc)) < 0.15).astype(jnp.float32)
        Wi = jax.random.normal(k5, (d_hidden, d_data), jnp.float32) / math.sqrt(d_hidden)
        We = jax.random.normal(jax.random.fold_in(k5, 1),
                               (d_hidden, d_data), jnp.float32) / math.sqrt(d_hidden)
        bi = jax.random.normal(jax.random.fold_in(k5, 2), (d_data,), jnp.float32) * 0.01
        be = jax.random.normal(jax.random.fold_in(k5, 3), (d_data,), jnp.float32) * 0.01

        pi, pe = attn_block_pallas(qc, kc, vc, mc, Wi, bi, We, be)
        ri, re = attn_block_reference(qc, kc, vc, mc, Wi, bi, We, be)
        jax.block_until_ready(pi)
        err = max(float(jnp.max(jnp.abs(pi - ri))),
                  float(jnp.max(jnp.abs(pe - re))))
        assert err < 3e-2, f"T={Tc}: kernel vs reference max abs err {err}"

    print("KERNEL_OK")
</pallas_src>

<mosaic_0001>
module attributes {stable_mosaic.version = 11 : i64} {
  func.func @_attn_flash_kernel(%arg0: i32, %arg1: i32, %arg2: i32, %arg3: memref<2x16x32xbf16, #tpu.memory_space<vmem>>, %arg4: memref<2x16x32xbf16, #tpu.memory_space<vmem>>, %arg5: memref<2x16x32xbf16, #tpu.memory_space<vmem>>, %arg6: memref<2x1x16xf32, #tpu.memory_space<vmem>>, %arg7: memref<64x8xbf16, #tpu.memory_space<vmem>>, %arg8: memref<1x1x8xf32, #tpu.memory_space<vmem>>, %arg9: memref<2x16x8xf32, #tpu.memory_space<vmem>>, %arg10: memref<2x16x1xf32, #tpu.memory_space<vmem>>, %arg11: memref<2x32x1xf32, #tpu.memory_space<vmem>>, %arg12: memref<2x32x32xf32, #tpu.memory_space<vmem>>) attributes {dimension_semantics = [#tpu.dimension_semantics<parallel>, #tpu.dimension_semantics<parallel>, #tpu.dimension_semantics<arbitrary>], iteration_bounds = array<i64: 1, 1, 1>, scalar_prefetch = 0 : i64, scratch_operands = 3 : i64, tpu.core_type = #tpu.core_type<tc>, window_params = [{transform_indices = @transform_0, window_bounds = array<i64: 2, 16, 32>}, {transform_indices = @transform_1, window_bounds = array<i64: 2, 16, 32>}, {transform_indices = @transform_2, window_bounds = array<i64: 2, 16, 32>}, {transform_indices = @transform_3, window_bounds = array<i64: 2, 1, 16>}, {pipeline_mode = #tpu.pipeline_mode<synchronous>, transform_indices = @transform_4, window_bounds = array<i64: 64, 8>}, {pipeline_mode = #tpu.pipeline_mode<synchronous>, transform_indices = @transform_5, window_bounds = array<i64: 1, 1, 8>}, {transform_indices = @transform_6, window_bounds = array<i64: 2, 16, 8>}]} {
    %c0_i32 = arith.constant 0 : i32
    %0 = arith.cmpi eq, %arg2, %c0_i32 : i32
    %1 = arith.extui %0 : i1 to i32
    %c0_i32_0 = arith.constant 0 : i32
    %2 = arith.cmpi ne, %1, %c0_i32_0 : i32
    scf.if %2 {
      %cst_41 = arith.constant -1.000000e+30 : f32
      %66 = vector.broadcast %cst_41 : f32 to vector<2x16x1xf32>
      %c0_42 = arith.constant 0 : index
      %c0_43 = arith.constant 0 : index
      %c0_44 = arith.constant 0 : index
      %67 = vector.load %arg10[%c0_42, %c0_43, %c0_44] : memref<2x16x1xf32, #tpu.memory_space<vmem>>, vector<2x16x1xf32>
      tpu.vector_store %arg10[%c0_42, %c0_43, %c0_44], %66 {strides = array<i32>} : memref<2x16x1xf32, #tpu.memory_space<vmem>>, vector<2x16x1xf32>,
      %cst_45 = arith.constant 0.000000e+00 : f32
      %68 = vector.broadcast %cst_45 : f32 to vector<2x32x1xf32>
      %c0_46 = arith.constant 0 : index
      %c0_47 = arith.constant 0 : index
      %c0_48 = arith.constant 0 : index
      %69 = vector.load %arg11[%c0_46, %c0_47, %c0_48] : memref<2x32x1xf32, #tpu.memory_space<vmem>>, vector<2x32x1xf32>
      tpu.vector_store %arg11[%c0_46, %c0_47, %c0_48], %68 {strides = array<i32>} : memref<2x32x1xf32, #tpu.memory_space<vmem>>, vector<2x32x1xf32>,
      %cst_49 = arith.constant 0.000000e+00 : f32
      %70 = vector.broadcast %cst_49 : f32 to vector<2x32x32xf32>
      %c0_50 = arith.constant 0 : index
      %c0_51 = arith.constant 0 : index
      %c0_52 = arith.constant 0 : index
      %71 = vector.load %arg12[%c0_50, %c0_51, %c0_52] : memref<2x32x32xf32, #tpu.memory_space<vmem>>, vector<2x32x32xf32>
      tpu.vector_store %arg12[%c0_50, %c0_51, %c0_52], %70 {strides = array<i32>} : memref<2x32x32xf32, #tpu.memory_space<vmem>>, vector<2x32x32xf32>,
    } else {
    }
    %c0 = arith.constant 0 : index
    %c0_1 = arith.constant 0 : index
    %c0_2 = arith.constant 0 : index
    %3 = vector.load %arg3[%c0, %c0_1, %c0_2] : memref<2x16x32xbf16, #tpu.memory_space<vmem>>, vector<2x16x32xbf16>
    %c0_3 = arith.constant 0 : index
    %c0_4 = arith.constant 0 : index
    %c0_5 = arith.constant 0 : index
    %4 = vector.load %arg4[%c0_3, %c0_4, %c0_5] : memref<2x16x32xbf16, #tpu.memory_space<vmem>>, vector<2x16x32xbf16>
    %c0_6 = arith.constant 0 : index
    %c0_7 = arith.constant 0 : index
    %c0_8 = arith.constant 0 : index
    %5 = vector.load %arg5[%c0_6, %c0_7, %c0_8] : memref<2x16x32xbf16, #tpu.memory_space<vmem>>, vector<2x16x32xbf16>
    %c0_9 = arith.constant 0 : index
    %c0_10 = arith.constant 0 : index
    %c0_11 = arith.constant 0 : index
    %6 = vector.load %arg6[%c0_9, %c0_10, %c0_11] : memref<2x1x16xf32, #tpu.memory_space<vmem>>, vector<2x1x16xf32>
    %cst = arith.constant 5.000000e-01 : f32
    %7 = vector.broadcast %cst : f32 to vector<2x1x16xf32>
    %8 = arith.cmpf ogt, %6, %7 : vector<2x1x16xf32>
    "tpu.trace_start"() <{level = 10 : i32, message = "bqh,bkh->bqk"}> : () -> ()
    %cst_12 = arith.constant dense<0.000000e+00> : vector<2x16x16xf32>
    %9 = tpu.matmul %3, %4, %cst_12 {dimension_numbers = #tpu.dot_dimension_numbers<[2], [2], [1], [1], [0, 0, 0, 1, 1, 1], [0], [0]>} : vector<2x16x32xbf16>, vector<2x16x32xbf16>, vector<2x16x16xf32> -> vector<2x16x16xf32>
    "tpu.trace_stop"() : () -> ()
    %cst_13 = arith.constant 0.176776692 : f32
    %10 = vector.broadcast %cst_13 : f32 to vector<2x16x16xf32>
    %11 = arith.mulf %9, %10 : vector<2x16x16xf32>
    %cst_14 = arith.constant -1.000000e+30 : f32
    %12 = vector.shape_cast %8 : vector<2x1x16xi1> to vector<2x1x16xi1>
    %13 = vector.broadcast %12 : vector<2x1x16xi1> to vector<2x16x16xi1>
    %14 = vector.broadcast %cst_14 : f32 to vector<2x16x16xf32>
    %15 = arith.select %13, %14, %11 : vector<2x16x16xi1>, vector<2x16x16xf32>
    %c16_i32 = arith.constant 16 : i32
    %16 = arith.muli %arg1, %c16_i32 : i32
    %17 = tpu.iota {dimensions = array<i32: 0>} : vector<16x16xi32>
    %18 = vector.broadcast %16 : i32 to vector<16x16xi32>
    %19 = arith.addi %18, %17 : vector<16x16xi32>
    %c16_i32_15 = arith.constant 16 : i32
    %20 = arith.muli %arg2, %c16_i32_15 : i32
    %21 = tpu.iota {dimensions = array<i32: 1>} : vector<16x16xi32>
    %22 = vector.broadcast %20 : i32 to vector<16x16xi32>
    %23 = arith.addi %22, %21 : vector<16x16xi32>
    %24 = arith.cmpi eq, %23, %19 : vector<16x16xi32>
    %25 = vector.shape_cast %24 : vector<16x16xi1> to vector<1x16x16xi1>
    %26 = arith.cmpi sgt, %23, %19 : vector<16x16xi32>
    %27 = vector.shape_cast %26 : vector<16x16xi1> to vector<1x16x16xi1>
    %c0_16 = arith.constant 0 : index
    %c0_17 = arith.constant 0 : index
    %c0_18 = arith.constant 0 : index
    %28 = vector.load %arg10[%c0_16, %c0_17, %c0_18] : memref<2x16x1xf32, #tpu.memory_space<vmem>>, vector<2x16x1xf32>
    %cst_19 = arith.constant dense<0xFF800000> : vector<2x16xf32>
    %29 = vector.multi_reduction <maximumf>, %15, %cst_19 [2] : vector<2x16x16xf32> to vector<2x16xf32>
    %30 = vector.shape_cast %29 : vector<2x16xf32> to vector<2x16x1xf32>
    %31 = arith.maximumf %28, %30 : vector<2x16x1xf32>
    %32 = arith.subf %28, %31 : vector<2x16x1xf32>
    %33 = math.exp %32 : vector<2x16x1xf32>
    %34 = vector.broadcast %31 : vector<2x16x1xf32> to vector<2x16x16xf32>
    %35 = arith.subf %15, %34 : vector<2x16x16xf32>
    %36 = math.exp %35 : vector<2x16x16xf32>
    %37 = vector.broadcast %8 : vector<2x1x16xi1> to vector<2x16x16xi1>
    %38 = vector.broadcast %25 : vector<1x16x16xi1> to vector<2x16x16xi1>
    %39 = arith.ori %37, %38 : vector<2x16x16xi1>
    %cst_20 = arith.constant 0.000000e+00 : f32
    %40 = vector.broadcast %cst_20 : f32 to vector<2x16x16xf32>
    %41 = arith.select %39, %40, %36 : vector<2x16x16xi1>, vector<2x16x16xf32>
    %42 = vector.broadcast %8 : vector<2x1x16xi1> to vector<2x16x16xi1>
    %43 = vector.broadcast %27 : vector<1x16x16xi1> to vector<2x16x16xi1>
    %44 = arith.ori %42, %43 : vector<2x16x16xi1>
    %cst_21 = arith.constant 0.000000e+00 : f32
    %45 = vector.broadcast %cst_21 : f32 to vector<2x16x16xf32>
    %46 = arith.select %44, %45, %36 : vector<2x16x16xi1>, vector<2x16x16xf32>
    %47 = tpu.concatenate %41, %46 in 1 : vector<2x16x16xf32>, vector<2x16x16xf32> -> vector<2x32x16xf32>
    %48 = tpu.concatenate %33, %33 in 1 : vector<2x16x1xf32>, vector<2x16x1xf32> -> vector<2x32x1xf32>
    %c0_22 = arith.constant 0 : index
    %c0_23 = arith.constant 0 : index
    %c0_24 = arith.constant 0 : index
    %49 = vector.load %arg11[%c0_22, %c0_23, %c0_24] : memref<2x32x1xf32, #tpu.memory_space<vmem>>, vector<2x32x1xf32>
    %50 = arith.mulf %48, %49 : vector<2x32x1xf32>
    %cst_25 = arith.constant dense<0.000000e+00> : vector<2x32xf32>
    %51 = vector.multi_reduction <add>, %47, %cst_25 [2] : vector<2x32x16xf32> to vector<2x32xf32>
    %52 = vector.shape_cast %51 : vector<2x32xf32> to vector<2x32x1xf32>
    %53 = arith.addf %50, %52 : vector<2x32x1xf32>
    %c0_26 = arith.constant 0 : index
    %c0_27 = arith.constant 0 : index
    %c0_28 = arith.constant 0 : index
    %54 = vector.load %arg11[%c0_26, %c0_27, %c0_28] : memref<2x32x1xf32, #tpu.memory_space<vmem>>, vector<2x32x1xf32>
    tpu.vector_store %arg11[%c0_26, %c0_27, %c0_28], %53 {strides = array<i32>} : memref<2x32x1xf32, #tpu.memory_space<vmem>>, vector<2x32x1xf32>,
    %c0_29 = arith.constant 0 : index
    %c0_30 = arith.constant 0 : index
    %c0_31 = arith.constant 0 : index
    %55 = vector.load %arg12[%c0_29, %c0_30, %c0_31] : memref<2x32x32xf32, #tpu.memory_space<vmem>>, vector<2x32x32xf32>
    %56 = vector.broadcast %48 : vector<2x32x1xf32> to vector<2x32x32xf32>
    %57 = arith.mulf %56, %55 : vector<2x32x32xf32>
    %58 = arith.truncf %47 : vector<2x32x16xf32> to vector<2x32x16xbf16>
    "tpu.trace_start"() <{level = 10 : i32, message = "bqk,bkh->bqh"}> : () -> ()
    %cst_32 = arith.constant dense<0.000000e+00> : vector<2x32x32xf32>
    %59 = tpu.matmul %58, %5, %cst_32 {dimension_numbers = #tpu.dot_dimension_numbers<[2], [1], [1], [2], [0, 0, 0, 1, 1, 2], [0], [0]>} : vector<2x32x16xbf16>, vector<2x16x32xbf16>, vector<2x32x32xf32> -> vector<2x32x32xf32>
    "tpu.trace_stop"() : () -> ()
    %60 = arith.addf %57, %59 : vector<2x32x32xf32>
    %c0_33 = arith.constant 0 : index
    %c0_34 = arith.constant 0 : index
    %c0_35 = arith.constant 0 : index
    %61 = vector.load %arg12[%c0_33, %c0_34, %c0_35] : memref<2x32x32xf32, #tpu.memory_space<vmem>>, vector<2x32x32xf32>
    tpu.vector_store %arg12[%c0_33, %c0_34, %c0_35], %60 {strides = array<i32>} : memref<2x32x32xf32, #tpu.memory_space<vmem>>, vector<2x32x32xf32>,
    %c0_36 = arith.constant 0 : index
    %c0_37 = arith.constant 0 : index
    %c0_38 = arith.constant 0 : index
    %62 = vector.load %arg10[%c0_36, %c0_37, %c0_38] : memref<2x16x1xf32, #tpu.memory_space<vmem>>, vector<2x16x1xf32>
    tpu.vector_store %arg10[%c0_36, %c0_37, %c0_38], %31 {strides = array<i32>} : memref<2x16x1xf32, #tpu.memory_space<vmem>>, vector<2x16x1xf32>,
    %c0_i32_39 = arith.constant 0 : i32
    %63 = arith.cmpi eq, %arg2, %c0_i32_39 : i32
    %64 = arith.extui %63 : i1 to i32
    %c0_i32_40 = arith.constant 0 : i32
    %65 = arith.cmpi ne, %64, %c0_i32_40 : i32
    scf.if %65 {
      %c0_41 = arith.constant 0 : index
      %c0_42 = arith.constant 0 : index
      %c0_43 = arith.constant 0 : index
      %66 = vector.load %arg11[%c0_41, %c0_42, %c0_43] : memref<2x32x1xf32, #tpu.memory_space<vmem>>, vector<2x32x1xf32>
      %cst_44 = arith.constant 0.000000e+00 : f32
      %67 = vector.broadcast %cst_44 : f32 to vector<2x32x1xf32>
      %68 = arith.cmpf ole, %66, %67 : vector<2x32x1xf32>
      %cst_45 = arith.constant 1.000000e+00 : f32
      %69 = vector.broadcast %cst_45 : f32 to vector<2x32x1xf32>
      %70 = arith.select %68, %69, %66 : vector<2x32x1xi1>, vector<2x32x1xf32>
      %c0_46 = arith.constant 0 : index
      %c0_47 = arith.constant 0 : index
      %c0_48 = arith.constant 0 : index
      %71 = vector.load %arg12[%c0_46, %c0_47, %c0_48] : memref<2x32x32xf32, #tpu.memory_space<vmem>>, vector<2x32x32xf32>
      %72 = tpu.reciprocal %70 {approx = true} : vector<2x32x1xf32> -> vector<2x32x1xf32>
      %73 = vector.broadcast %72 : vector<2x32x1xf32> to vector<2x32x32xf32>
      %74 = arith.mulf %71, %73 : vector<2x32x32xf32>
      %75 = vector.extract_strided_slice %74 {offsets = [0, 0, 0], sizes = [2, 16, 32], strides = [1, 1, 1]} : vector<2x32x32xf32> to vector<2x16x32xf32>
      %76 = vector.extract_strided_slice %74 {offsets = [0, 16, 0], sizes = [2, 16, 32], strides = [1, 1, 1]} : vector<2x32x32xf32> to vector<2x16x32xf32>
      %77 = tpu.concatenate %75, %76 in 2 : vector<2x16x32xf32>, vector<2x16x32xf32> -> vector<2x16x64xf32>
      %78 = vector.shape_cast %77 : vector<2x16x64xf32> to vector<32x64xf32>
      %79 = arith.truncf %78 : vector<32x64xf32> to vector<32x64xbf16>
      %c0_49 = arith.constant 0 : index
      %c0_50 = arith.constant 0 : index
      %80 = vector.load %arg7[%c0_49, %c0_50] : memref<64x8xbf16, #tpu.memory_space<vmem>>, vector<64x8xbf16>
      %cst_51 = arith.constant dense<0.000000e+00> : vector<32x8xf32>
      %81 = tpu.matmul %79, %80, %cst_51 {dimension_numbers = #tpu.dot_dimension_numbers<[1], [0], [0], [1], [0, 0, 1, 1], [], []>} : vector<32x64xbf16>, vector<64x8xbf16>, vector<32x8xf32> -> vector<32x8xf32>
      %82 = vector.shape_cast %81 : vector<32x8xf32> to vector<2x16x8xf32>
      %c0_52 = arith.constant 0 : index
      %c0_53 = arith.constant 0 : index
      %c0_54 = arith.constant 0 : index
      %83 = vector.load %arg8[%c0_52, %c0_53, %c0_54] : memref<1x1x8xf32, #tpu.memory_space<vmem>>, vector<1x1x8xf32>
      %84 = vector.broadcast %83 : vector<1x1x8xf32> to vector<2x16x8xf32>
      %85 = arith.addf %82, %84 : vector<2x16x8xf32>
      %c0_55 = arith.constant 0 : index
      %c0_56 = arith.constant 0 : index
      %c0_57 = arith.constant 0 : index
      %86 = vector.load %arg9[%c0_55, %c0_56, %c0_57] : memref<2x16x8xf32, #tpu.memory_space<vmem>>, vector<2x16x8xf32>
      tpu.vector_store %arg9[%c0_55, %c0_56, %c0_57], %85 {strides = array<i32>} : memref<2x16x8xf32, #tpu.memory_space<vmem>>, vector<2x16x8xf32>,
    } else {
    }
    return
  }
  func.func @transform_0(%arg0: i32, %arg1: i32, %arg2: i32) -> (i32, i32, i32) {
    %c0_i32 = arith.constant 0 : i32
    %c0_i32_0 = arith.constant 0 : i32
    return %arg0, %arg1, %c0_i32 : i32, i32, i32
  }
  func.func @transform_1(%arg0: i32, %arg1: i32, %arg2: i32) -> (i32, i32, i32) {
    %c0_i32 = arith.constant 0 : i32
    %c0_i32_0 = arith.constant 0 : i32
    return %arg0, %arg2, %c0_i32 : i32, i32, i32
  }
  func.func @transform_2(%arg0: i32, %arg1: i32, %arg2: i32) -> (i32, i32, i32) {
    %c0_i32 = arith.constant 0 : i32
    %c0_i32_0 = arith.constant 0 : i32
    return %arg0, %arg2, %c0_i32 : i32, i32, i32
  }
  func.func @transform_3(%arg0: i32, %arg1: i32, %arg2: i32) -> (i32, i32, i32) {
    %c0_i32 = arith.constant 0 : i32
    %c0_i32_0 = arith.constant 0 : i32
    return %arg0, %c0_i32, %arg2 : i32, i32, i32
  }
  func.func @transform_4(%arg0: i32, %arg1: i32, %arg2: i32) -> (i32, i32) {
    %c0_i32 = arith.constant 0 : i32
    %c0_i32_0 = arith.constant 0 : i32
    %c0_i32_1 = arith.constant 0 : i32
    return %c0_i32, %c0_i32_0 : i32, i32
  }
  func.func @transform_5(%arg0: i32, %arg1: i32, %arg2: i32) -> (i32, i32, i32) {
    %c0_i32 = arith.constant 0 : i32
    %c0_i32_0 = arith.constant 0 : i32
    %c0_i32_1 = arith.constant 0 : i32
    %c0_i32_2 = arith.constant 0 : i32
    return %c0_i32, %c0_i32_0, %c0_i32_1 : i32, i32, i32
  }
  func.func @transform_6(%arg0: i32, %arg1: i32, %arg2: i32) -> (i32, i32, i32) {
    %c0_i32 = arith.constant 0 : i32
    %c0_i32_0 = arith.constant 0 : i32
    return %arg0, %arg1, %c0_i32 : i32, i32, i32
  }
}

</mosaic_0001>

<bundles_post_ra>
// kernel: tpu_custom_call.1
= control target key start
LH: loop header
LB: loop body
LE: loop exit
PB: predicated region body
PF: predicated region fallthrough
CT: control target
= control target key end

     0   :  { %11 = vsyncpa [#allocation6], 0  ;;  %s938_s21 = smov [#allocation5]   ;;  %s1210_s0 = inlined_call_operand.vmem [shape: bf16[2,16,32], index: 0, kind: input, shape index: {}]   ;;  %s1211_s1 = inlined_call_operand.vmem [shape: bf16[2,16,32], index: 1, kind: input, shape index: {}]   ;;  %s1212_s2 = inlined_call_operand.hbm [shape: bf16[2,16,32], index: 2, kind: input, shape index: {}]   ;;  %s1213_s3 = inlined_call_operand.vmem [shape: f32[2,1,16], index: 3, kind: input, shape index: {}]   ;;  %s1214_s4 = inlined_call_operand.vmem [shape: bf16[64,8], index: 4, kind: input, shape index: {}]   ;;  %s1215_s5 = inlined_call_operand.vmem [shape: f32[1,1,8], index: 5, kind: input, shape index: {}]   ;;  %s1216_s6 = inlined_call_operand.vmem [shape: f32[2,16,8], index: 6, kind: output, shape index: {}]  }
   0x1   :  { %s21_s22 = sshll.u32 %s938_s21, 4  ;;  %s914_s25 = scalar_lea.hbm %s1212_s2, 256  ;;  %s22_s22 = int_to_ptr.vmem [resolvable:$true] %s21_s22 }
   0x2   :  { %p915_p0 = scmp.ne.s32.totalorder %s1212_s2, %s914_s25  ;;  %p918_p1 = scmp.lt.u32.totalorder %s914_s25, %s1212_s2 }
   0x4   :  { %p920_p2 = pnand %p918_p1, %p915_p0 }
   0x6   :  { %923 = shalt.err (!%p920_p2)
}
   0x7   :  { %s924_s30 = scalar_lea.vmem %s22_s22, 256  ;;  %p929_p4 = scmp.lt.s32.totalorder %s22_s22, %s22_s22 }
   0x8   :  { %p925_p3 = scmp.ne.s32.totalorder %s22_s22, %s924_s30  ;;  %p930_p5 = scmp.lt.s32.totalorder %s924_s30, %s924_s30 }
   0xa   :  { %p931_p6 = por %p930_p5, %p929_p4 }
   0xc   :  { %p932_p7 = pnand %p931_p6, %p925_p3 }
   0xe   :  { %935 = shalt.err (!%p932_p7)
}
   0xf   :  { %s939_s7 = smov 64   ;;  %s940_s8 = smov 4  }
  0x10   :  { %27 = dma.hbm_to_vmem [thread:$0]  %s1212_s2, 256, %s22_s22, [#allocation6], %s939_s7, %s939_s7, %s940_s8  }
  0x11   :  { %936 = dma.done.wait [#allocation6], 256  }
  0x12   :  { %937 = vsyncadd [#allocation6], 4294967040  ;;  %vm55_vm0 = vcmask 261120   ;;  %v941_v0 = vmov 0.0   ;;  %vm942_vm1 = vmmov 0   ;;  %v872_v1 = vld [vmem:[%s1211_s1] sm:$0xff]   ;;  %v201_v9 = vlaneseq }
  0x13   :  { %816 = vmatprep.subr.bf16.mxu1 %v941_v0  ;;  %56 = vst.msk [vmem:[#allocation4] sm:$0xff] %vm55_vm0, %v941_v0  ;;  %57 = vst.msk [vmem:[#allocation4 + $0x8] sm:$0xff] %vm55_vm0, %v941_v0  ;;  %818 = vmatprep.mubr.msk.bf16.mxu1 %vm942_vm1, %v941_v0  ;;  %v95_v2 = vsel %vm55_vm0, %v872_v1, 0  ;;  %v873_v3 = vld [vmem:[%s1210_s0] sm:$0xff]   ;;  %v874_v4 = vld [vmem:[%s1211_s1 + $0x8] sm:$0xff]   ;;  %v943_v7 = vmov 0  }
  0x14   :  { %58 = vst.msk [vmem:[#allocation4 + $0x10] sm:$0xff] %vm55_vm0, %v941_v0  ;;  %59 = vst.msk [vmem:[#allocation4 + $0x18] sm:$0xff] %vm55_vm0, %v941_v0  ;;  %817 = vmatpush3.bf16.xpose.msra.mxu1 %v95_v2  ;;  %v152_v5 = vsel %vm55_vm0, %v874_v4, 0  ;;  %v875_v6 = vld [vmem:[%s1210_s0 + $0x8] sm:$0xff]   ;;  %860 = vset.pattern.permute.xlu0 %v943_v7  ;;  %vm42_vm2 = vcmask 7168   ;;  %v1033_v11 = vshrl.u32 %v201_v9, 7 }
  0x15   :  { %60 = vst.msk [vmem:[#allocation4 + $0x20] sm:$0xff] %vm55_vm0, %v941_v0  ;;  %61 = vst.msk [vmem:[#allocation4 + $0x28] sm:$0xff] %vm55_vm0, %v941_v0  ;;  %822 = vmatprep.subr.bf16.mxu1 %v941_v0  ;;  %861 = vset.pattern.permute.xlu1 %v943_v7  ;;  %v944_v8 = vmov -1e+30   ;;  %v76_v10 = vld [vmem:[%s1213_s3] sm:$0x1] }
  0x16   :  { %62 = vst.msk [vmem:[#allocation4 + $0x30] sm:$0xff] %vm55_vm0, %v941_v0  ;;  %63 = vst.msk [vmem:[#allocation4 + $0x38] sm:$0xff] %vm55_vm0, %v941_v0  ;;  %vm78_vm3 = vcmp.gt.f32.partialorder %v76_v10, 0.5  ;;  %v203_v12 = vsub.s32 0, %v1033_v11  ;;  %v77_v14 = vld [vmem:[%s1213_s3 + $0x1] sm:$0x1] }
  0x17   :  { %43 = vst.msk [vmem:[#allocation2] sm:$0xff] %vm42_vm2, %v944_v8  ;;  %44 = vst.msk [vmem:[#allocation2 + $0x8] sm:$0xff] %vm42_vm2, %v944_v8  ;;  %v199_v13 = vsel %vm78_vm3, 1, %v943_v7  ;;  %vm79_vm4 = vcmp.gt.f32.partialorder %v77_v14, 0.5  ;;  %vm235_vm6 = vcmask 130048   ;;  %v876_v54 = vld [vmem:[#allocation5] sm:$0xff]  }
  0x18   :  { %45 = vst.msk [vmem:[#allocation2 + $0x10] sm:$0xff] %vm42_vm2, %v944_v8  ;;  %46 = vst.msk [vmem:[#allocation2 + $0x18] sm:$0xff] %vm42_vm2, %v944_v8  ;;  %v1039_v15 = vrot.slane %v199_v13, %v203_v12  ;;  %v200_v19 = vsel %vm79_vm4, 1, %v943_v7  ;;  %828 = vmatprep.subr.bf16.mxu0 %v876_v54  ;;  %v877_v55 = vld [vmem:[#allocation5 + $0x8] sm:$0xff]   ;;  %v224_v61 = vand.u32 127, %v201_v9  ;;  %v218_v1 = vadd.s32 8, %v1033_v11 }
  0x19   :  { %47 = vst.msk [vmem:[#allocation3] sm:$0xff] %vm42_vm2, %v941_v0  ;;  %48 = vst.msk [vmem:[#allocation3 + $0x8] sm:$0xff] %vm42_vm2, %v941_v0  ;;  %v1045_v25 = vrot.slane %v200_v19, %v203_v12  ;;  %829 = vmatpush3.bf16.msra.mxu0 %v876_v54  ;;  %s945_s27 = smov 32  }
  0x1a   :  { %49 = vst.msk [vmem:[#allocation3 + $0x10] sm:$0xff] %vm42_vm2, %v941_v0  ;;  %50 = vst.msk [vmem:[#allocation3 + $0x18] sm:$0xff] %vm42_vm2, %v941_v0  ;;  %vm209_vm5 = vcmp.eq.s32.totalorder %v1039_v15, 1  ;;  %vm229_vm8 = vcmp.gt.s32.totalorder %v224_v61, %v1033_v11  ;;  %vm227_vm9 = vcmp.eq.s32.totalorder %v224_v61, %v1033_v11  ;;  %vm230_vm11 = vcmp.gt.s32.totalorder %v224_v61, %v218_v1 }
  0x1b   :  { %819 = vmatmul.mubr.msk.bf16.vlgmr.msra.gmra.mrb[0].mxu1 %vm55_vm0, %v873_v3  ;;  %51 = vst.msk [vmem:[#allocation3 + $0x20] sm:$0xff] %vm42_vm2, %v941_v0  ;;  %52 = vst.msk [vmem:[#allocation3 + $0x28] sm:$0xff] %vm42_vm2, %v941_v0  ;;  %vm210_vm7 = vcmp.eq.s32.totalorder %v1045_v25, 1  ;;  %vm228_vm12 = vcmp.eq.s32.totalorder %v224_v61, %v218_v1 }
  0x1c   :  { %823 = vmatpush3.bf16.xpose.msra.mxu1 %v152_v5  ;;  %824 = vmatprep.mubr.msk.bf16.mxu1 %vm942_vm1, %v941_v0  ;;  %53 = vst.msk [vmem:[#allocation3 + $0x30] sm:$0xff] %vm42_vm2, %v941_v0  ;;  %54 = vst.msk [vmem:[#allocation3 + $0x38] sm:$0xff] %vm42_vm2, %v941_v0 }
  0x1d   :  { %834 = vmatprep.subr.bf16.mxu1 %v877_v55  ;;  %vm312_vm10 = vmor %vm209_vm5, %vm229_vm8 }
  0x1e   :  { %v1057_v38 = vld [vmem:[#allocation2] sm:$0xff]  ;;  %v1062_v41 = vld [vmem:[#allocation2 + $0x8] sm:$0xff]  ;;  %vm300_vm13 = vmor %vm209_vm5, %vm227_vm9 }
  0x1f   :  { %v1072_v45 = vld [vmem:[#allocation2 + $0x10] sm:$0xff]  ;;  %v1082_v49 = vld [vmem:[#allocation2 + $0x18] sm:$0xff]  ;;  %vm313_vm14 = vmor %vm209_vm5, %vm230_vm11 }
  0x20   :  { %vm301_vm15 = vmor %vm209_vm5, %vm228_vm12 }
  0x21   :  { %vm302_vm1 = vmor %vm210_vm7, %vm227_vm9 }
  0x22   :  { %vm314_vm3 = vmor %vm210_vm7, %vm229_vm8 }
  0x23   :  { %825 = vmatmul.mubr.msk.bf16.vlgmr.msra.gmra.mrb[4].mxu1 %vm55_vm0, %v875_v6  ;;  %vm303_vm4 = vmor %vm210_vm7, %vm228_vm12 }
  0x24   :  { %835 = vmatpush3.bf16.msra.mxu1 %v877_v55 }
  0xee   :  { %v131_v16 = vpop.f32.mrb[0].mxu1 }
  0xef   :  { %v195_v17 = vmul.f32 0.17677669, %v131_v16  ;;  %v820_v18 = vpop.f32.mrb[1].mxu1 }
  0xf0   :  { %v134_v20 = vpop.f32.mrb[2].mxu1 }
  0xf1   :  { %v196_v21 = vmul.f32 0.17677669, %v134_v20  ;;  %v821_v22 = vpop.f32.mrb[3].mxu1  ;;  %v211_v23 = vsel %vm209_vm5, -1e+30, %v195_v17 }
  0xf2   :  { %v236_v24 = vsel %vm235_vm6, %v211_v23, -inf }
  0xf3   :  { %237 = vmax.xlane.f32.xlu0 %v236_v24  ;;  %v212_v26 = vsel %vm209_vm5, -1e+30, %v196_v21  ;;  %vm315_vm5 = vmor %vm210_vm7, %vm230_vm11 }
  0xf4   :  { %v239_v28 = vsel %vm235_vm6, %v212_v26, -inf }
  0xf6   :  { %v188_v27 = vpop.f32.mrb[4].mxu1 }
  0xf7   :  { %v197_v29 = vmul.f32 0.17677669, %v188_v27  ;;  %240 = vmax.xlane.f32.xlu0 %v239_v28  ;;  %v826_v30 = vpop.f32.mrb[5].mxu1 }
  0xf8   :  { %v191_v31 = vpop.f32.mrb[6].mxu1 }
  0xf9   :  { %v198_v32 = vmul.f32 0.17677669, %v191_v31  ;;  %v827_v33 = vpop.f32.mrb[7].mxu1  ;;  %v213_v34 = vsel %vm210_vm7, -1e+30, %v197_v29 }
  0xfa   :  { %v242_v35 = vsel %vm235_vm6, %v213_v34, -inf }
  0xfb   :  { %243 = vmax.xlane.f32.xlu1 %v242_v35  ;;  %v214_v36 = vsel %vm210_vm7, -1e+30, %v198_v32 }
  0xfc   :  { %v245_v37 = vsel %vm235_vm6, %v214_v36, -inf }
  0xff   :  { %246 = vmax.xlane.f32.xlu1 %v245_v37 }
 0x180   :  { %v238_v39 = vpop.xlane.xlu0 %237 }
 0x181   :  { %v1060_v40 = vmax.f32 %v1057_v38, %v238_v39 }
 0x183   :  { %v252_v42 = vsub.f32 %v1057_v38, %v1060_v40  ;;  %555 = vst.msk [vmem:[#allocation2] sm:$0xff] %vm42_vm2, %v1060_v40  ;;  %266 = vperm.xlu0 %860, %v1060_v40   ;;  %v322_v38 = vld [vmem:[#allocation3 + $0x10] sm:$0xff] }
 0x184   :  { %v241_v43 = vpop.xlane.xlu0 %240 }
 0x185   :  { %v1070_v44 = vmax.f32 %v1062_v41, %v241_v43  ;;  %v256_v24 = vmul.f32 1.442695, %v252_v42  ;;  %v323_v42 = vld [vmem:[#allocation3 + $0x18] sm:$0xff] }
 0x187   :  { %v253_v46 = vsub.f32 %v1062_v41, %v1070_v44  ;;  %556 = vst.msk [vmem:[#allocation2 + $0x8] sm:$0xff] %vm42_vm2, %v1070_v44  ;;  %271 = vperm.xlu1 %861, %v1070_v44   ;;  %v320_v41 = vld [vmem:[#allocation3] sm:$0xff] }
 0x188   :  { %v244_v47 = vpop.xlane.xlu1 %243 }
 0x189   :  { %v1080_v48 = vmax.f32 %v1072_v45, %v244_v47  ;;  %v258_v29 = vmul.f32 1.442695, %v253_v46 }
 0x18b   :  { %v254_v50 = vsub.f32 %v1072_v45, %v1080_v48  ;;  %557 = vst.msk [vmem:[#allocation2 + $0x10] sm:$0xff] %vm42_vm2, %v1080_v48  ;;  %276 = vperm.xlu1 %861, %v1080_v48   ;;  %v321_v48 = vld [vmem:[#allocation3 + $0x8] sm:$0xff] }
 0x18c   :  { %v247_v51 = vpop.xlane.xlu1 %246 }
 0x18d   :  { %v1090_v52 = vmax.f32 %v1082_v49, %v247_v51  ;;  %v260_v30 = vmul.f32 1.442695, %v254_v50 }
 0x18f   :  { %v255_v53 = vsub.f32 %v1082_v49, %v1090_v52  ;;  %558 = vst.msk [vmem:[#allocation2 + $0x18] sm:$0xff] %vm42_vm2, %v1090_v52  ;;  %281 = vperm.xlu1 %861, %v1090_v52  }
 0x191   :  { %v262_v35 = vmul.f32 1.442695, %v255_v53  ;;  %v326_v53 = vld [vmem:[#allocation3 + $0x30] sm:$0xff] }
 0x202   :  { %v267_v56 = vpop.permute.xlu0 %266 }
 0x203   :  { %v284_v57 = vsub.f32 %v211_v23, %v267_v56 }
 0x205   :  { %v288_v58 = vmul.f32 1.442695, %v284_v57 }
 0x206   :  { %v272_v59 = vpop.permute.xlu1 %271 }
 0x207   :  { %882 = vpow2.f32 %v288_v58  ;;  %v285_v60 = vsub.f32 %v212_v26, %v272_v59  ;;  %v327_v58 = vld [vmem:[#allocation3 + $0x38] sm:$0xff] }
 0x209   :  { %v290_v62 = vmul.f32 1.442695, %v285_v60 }
 0x20a   :  { %v277_v63 = vpop.permute.xlu1 %276 }
 0x20b   :  { %884 = vpow2.f32 %v290_v62  ;;  %v286_v0 = vsub.f32 %v213_v34, %v277_v63 }
 0x20d   :  { %v292_v2 = vmul.f32 1.442695, %v286_v0 }
 0x20e   :  { %v282_v3 = vpop.permute.xlu1 %281 }
 0x20f   :  { %886 = vpow2.f32 %v292_v2  ;;  %v287_v4 = vsub.f32 %v214_v36, %v282_v3 }
 0x211   :  { %v883_v5 = vpop.eup %882  ;;  %v294_v6 = vmul.f32 1.442695, %v287_v4 }
 0x212   :  { %v316_v7 = vsel %vm312_vm10, 0.0, %v883_v5  ;;  %v304_v9 = vsel %vm300_vm13, 0.0, %v883_v5  ;;  %vm704_vm13 = vcmask 523264  }
 0x213   :  { %888 = vpow2.f32 %v294_v6  ;;  %v342_v8 = vsel %vm235_vm6, %v316_v7, 0.0  ;;  %v336_v17 = vsel %vm235_vm6, %v304_v9, 0.0 }
 0x214   :  { %343 = vadd.xlane.f32.xlu1 %v342_v8  ;;  %890 = vpow2.f32 %v256_v24  ;;  %v325_v24 = vld [vmem:[#allocation3 + $0x28] sm:$0xff] }
 0x215   :  { %v885_v10 = vpop.eup %884  ;;  %892 = vpow2.f32 %v258_v29 }
 0x216   :  { %v317_v12 = vsel %vm313_vm14, 0.0, %v885_v10  ;;  %v305_v13 = vsel %vm301_vm15, 0.0, %v885_v10  ;;  %894 = vpow2.f32 %v260_v30  ;;  %v380_v30 = vld [vmem:[#allocation4 + $0x18] sm:$0xff]  ;;  %vm771_vm14 = vcmask 64512  }
 0x217   :  { %v345_v14 = vsel %vm235_vm6, %v317_v12, 0.0  ;;  %v414_v16 = vpack.c.bf16 %v317_v12, %v316_v7  ;;  %v413_v18 = vpack.c.bf16 %v305_v13, %v304_v9  ;;  %v339_v19 = vsel %vm235_vm6, %v305_v13, 0.0 }
 0x218   :  { %346 = vadd.xlane.f32.xlu0 %v345_v14  ;;  %337 = vadd.xlane.f32.xlu1 %v336_v17  ;;  %896 = vpow2.f32 %v262_v35 }
 0x219   :  { %v887_v15 = vpop.eup %886  ;;  %830 = vmatprep.mubr.msk.bf16.mxu0 %vm235_vm6, %v413_v18 }
 0x21a   :  { %831 = vmatmul.mubr.msk.bf16.vlgmr.msra.gmra.mrb[0].mxu0 %vm235_vm6, %v414_v16  ;;  %v318_v20 = vsel %vm314_vm3, 0.0, %v887_v15  ;;  %v306_v22 = vsel %vm302_vm1, 0.0, %v887_v15  ;;  %v324_v15 = vld [vmem:[#allocation3 + $0x20] sm:$0xff] }
 0x21b   :  { %v354_v26 = vsel %vm235_vm6, %v318_v20, 0.0  ;;  %v348_v34 = vsel %vm235_vm6, %v306_v22, 0.0 }
 0x21c   :  { %340 = vadd.xlane.f32.xlu1 %v339_v19 }
 0x21d   :  { %v889_v21 = vpop.eup %888 }
 0x21e   :  { %v307_v11 = vsel %vm303_vm4, 0.0, %v889_v21  ;;  %v319_v23 = vsel %vm315_vm5, 0.0, %v889_v21  ;;  %v891_v31 = vpop.eup %890 }
 0x21f   :  { %v416_v27 = vpack.c.bf16 %v319_v23, %v318_v20  ;;  %v415_v28 = vpack.c.bf16 %v307_v11, %v306_v22  ;;  %v357_v25 = vsel %vm235_vm6, %v319_v23, 0.0  ;;  %v893_v32 = vpop.eup %892  ;;  %v351_v36 = vsel %vm235_vm6, %v307_v11, 0.0 }
 0x220   :  { %355 = vadd.xlane.f32.xlu1 %v354_v26  ;;  %v1148_v33 = vpop.eup %894  ;;  %v330_v39 = vmul.f32 %v891_v31, %v322_v38  ;;  %v328_v44 = vmul.f32 %v891_v31, %v320_v41  ;;  %v331_v45 = vmul.f32 %v893_v32, %v323_v42  ;;  %v329_v51 = vmul.f32 %v893_v32, %v321_v48  ;;  %v384_v48 = vld [vmem:[#allocation4 + $0x38] sm:$0xff] }
 0x221   :  { %836 = vmatprep.mubr.msk.bf16.mxu1 %vm235_vm6, %v415_v28  ;;  %v334_v56 = vmul.f32 %v1148_v33, %v326_v53  ;;  %v332_v19 = vmul.f32 %v1148_v33, %v324_v15 }
 0x222   :  { %837 = vmatmul.mubr.msk.bf16.vlgmr.msra.gmra.mrb[8].mxu1 %vm235_vm6, %v416_v27  ;;  %v1156_v37 = vpop.eup %896  ;;  %v379_v27 = vld [vmem:[#allocation4 + $0x10] sm:$0xff] }
 0x223   :  { %v335_v62 = vmul.f32 %v1156_v37, %v327_v58  ;;  %v333_v28 = vmul.f32 %v1156_v37, %v325_v24 }
 0x224   :  { %358 = vadd.xlane.f32.xlu1 %v357_v25  ;;  %v377_v25 = vld [vmem:[#allocation4] sm:$0xff] }
 0x22e   :  { %387 = vperm.xlu0 %860, %v891_v31  }
 0x235   :  { %392 = vperm.xlu1 %861, %v893_v32  }
 0x239   :  { %397 = vperm.xlu1 %861, %v1148_v33   ;;  %v378_v33 = vld [vmem:[#allocation4 + $0x8] sm:$0xff] }
 0x24d   :  { %349 = vadd.xlane.f32.xlu0 %v348_v34 }
 0x25d   :  { %352 = vadd.xlane.f32.xlu1 %v351_v36 }
 0x263   :  { %402 = vperm.xlu0 %860, %v1156_v37  }
 0x2a1   :  { %v344_v40 = vpop.xlane.xlu1 %343 }
 0x2a2   :  { %v362_v43 = vadd.f32 %v344_v40, %v330_v39 }
 0x2a4   :  { %371 = vst.msk [vmem:[#allocation3 + $0x10] sm:$0xff] %vm42_vm2, %v362_v43 }
 0x2a5   :  { %v338_v46 = vpop.xlane.xlu1 %337  ;;  %v347_v47 = vpop.xlane.xlu0 %346 }
 0x2a6   :  { %v360_v49 = vadd.f32 %v338_v46, %v328_v44  ;;  %v363_v50 = vadd.f32 %v347_v47, %v331_v45  ;;  %v383_v45 = vld [vmem:[#allocation4 + $0x30] sm:$0xff]  ;;  %v381_v47 = vld [vmem:[#allocation4 + $0x20] sm:$0xff] }
 0x2a8   :  { %369 = vst.msk [vmem:[#allocation3] sm:$0xff] %vm42_vm2, %v360_v49  ;;  %372 = vst.msk [vmem:[#allocation3 + $0x18] sm:$0xff] %vm42_vm2, %v363_v50 }
 0x2a9   :  { %v341_v52 = vpop.xlane.xlu1 %340 }
 0x2aa   :  { %v361_v54 = vadd.f32 %v341_v52, %v329_v51  ;;  %v382_v51 = vld [vmem:[#allocation4 + $0x28] sm:$0xff] }
 0x2ab   :  { %v564_v55 = vld [vmem:[#allocation3 + $0x10] sm:$0xff] }
 0x2ac   :  { %370 = vst.msk [vmem:[#allocation3 + $0x8] sm:$0xff] %vm42_vm2, %v361_v54  ;;  %vm572_vm6 = vcmp.le.f32.partialorder %v564_v55, 0.0 }
 0x2ad   :  { %v356_v57 = vpop.xlane.xlu1 %355  ;;  %v580_v59 = vsel %vm572_vm6, 1.0, %v564_v55  ;;  %v388_v18 = vpop.permute.xlu0 %387 }
 0x2ae   :  { %v366_v60 = vadd.f32 %v356_v57, %v334_v56  ;;  %898 = vrcp.f32 %v580_v59  ;;  %v407_v32 = vmul.f32 %v388_v18, %v379_v27  ;;  %v405_v34 = vmul.f32 %v388_v18, %v377_v25 }
 0x2af   :  { %v565_v61 = vld [vmem:[#allocation3 + $0x18] sm:$0xff]  ;;  %v562_v2 = vld [vmem:[#allocation3] sm:$0xff] }
 0x2b0   :  { %375 = vst.msk [vmem:[#allocation3 + $0x30] sm:$0xff] %vm42_vm2, %v366_v60  ;;  %vm573_vm7 = vcmp.le.f32.partialorder %v565_v61, 0.0  ;;  %vm570_vm8 = vcmp.le.f32.partialorder %v562_v2, 0.0 }
 0x2b1   :  { %v359_v63 = vpop.xlane.xlu1 %358  ;;  %v581_v0 = vsel %vm573_vm7, 1.0, %v565_v61  ;;  %v578_v7 = vsel %vm570_vm8, 1.0, %v562_v2  ;;  %v878_v2 = vld [vmem:[%s1214_s4] sm:$0xff]  }
 0x2b2   :  { %v367_v1 = vadd.f32 %v359_v63, %v335_v62  ;;  %900 = vrcp.f32 %v581_v0  ;;  %840 = vmatprep.subr.bf16.mxu0 %v878_v2 }
 0x2b3   :  { %v563_v6 = vld [vmem:[#allocation3 + $0x8] sm:$0xff]  ;;  %841 = vmatpush3.bf16.msra.mxu0 %v878_v2 }
 0x2b4   :  { %376 = vst.msk [vmem:[#allocation3 + $0x38] sm:$0xff] %vm42_vm2, %v367_v1  ;;  %vm571_vm11 = vcmp.le.f32.partialorder %v563_v6, 0.0 }
 0x2b5   :  { %v579_v12 = vsel %vm571_vm11, 1.0, %v563_v6  ;;  %v393_v22 = vpop.permute.xlu1 %392 }
 0x2b6   :  { %v408_v36 = vmul.f32 %v393_v22, %v380_v30  ;;  %v406_v40 = vmul.f32 %v393_v22, %v378_v33 }
 0x2b7   :  { %v568_v3 = vld [vmem:[#allocation3 + $0x30] sm:$0xff] }
 0x2b8   :  { %v899_v4 = vpop.eup %898  ;;  %vm576_vm9 = vcmp.le.f32.partialorder %v568_v3, 0.0 }
 0x2b9   :  { %614 = vperm.xlu1 %861, %v899_v4   ;;  %v584_v5 = vsel %vm576_vm9, 1.0, %v568_v3  ;;  %v398_v23 = vpop.permute.xlu1 %397  ;;  %v879_v3 = vld [vmem:[%s1214_s4 + $0x8] sm:$0xff]   ;;  %v880_v4 = vld [vmem:[%s1214_s4 + $0x10] sm:$0xff]  }
 0x2ba   :  { %902 = vrcp.f32 %v584_v5  ;;  %v411_v50 = vmul.f32 %v398_v23, %v383_v45  ;;  %v409_v53 = vmul.f32 %v398_v23, %v381_v47  ;;  %842 = vmatprep.subr.bf16.mxu0 %v879_v3 }
 0x2bb   :  { %v569_v8 = vld [vmem:[#allocation3 + $0x38] sm:$0xff]  ;;  %904 = vrcp.f32 %v578_v7  ;;  %843 = vmatpush3.bf16.msra.mxu0 %v879_v3 }
 0x2bc   :  { %v901_v9 = vpop.eup %900  ;;  %vm577_vm10 = vcmp.le.f32.partialorder %v569_v8, 0.0  ;;  %844 = vmatprep.subr.bf16.mxu0 %v880_v4 }
 0x2bd   :  { %619 = vperm.xlu0 %860, %v901_v9   ;;  %v585_v10 = vsel %vm577_vm10, 1.0, %v569_v8 }
 0x2be   :  { %906 = vrcp.f32 %v585_v10 }
 0x2bf   :  { %908 = vrcp.f32 %v579_v12  ;;  %845 = vmatpush3.bf16.msra.mxu0 %v880_v4 }
 0x2c4   :  { %v903_v13 = vpop.eup %902 }
 0x2c5   :  { %634 = vperm.xlu1 %861, %v903_v13   ;;  %v905_v14 = vpop.eup %904  ;;  %v881_v13 = vld [vmem:[%s1214_s4 + $0x18] sm:$0xff]  }
 0x2c6   :  { %846 = vmatprep.subr.bf16.mxu0 %v881_v13 }
 0x2c7   :  { %847 = vmatpush3.bf16.msra.mxu0 %v881_v13 }
 0x2c8   :  { %v907_v16 = vpop.eup %906 }
 0x2c9   :  { %639 = vperm.xlu0 %860, %v907_v16   ;;  %604 = vperm.xlu1 %861, %v905_v14   ;;  %v909_v17 = vpop.eup %908 }
 0x2cd   :  { %609 = vperm.xlu0 %860, %v909_v17  }
 0x2da   :  { %v350_v20 = vpop.xlane.xlu0 %349 }
 0x2db   :  { %v364_v21 = vadd.f32 %v350_v20, %v332_v19 }
 0x2dd   :  { %373 = vst.msk [vmem:[#allocation3 + $0x20] sm:$0xff] %vm42_vm2, %v364_v21 }
 0x2e2   :  { %v403_v49 = vpop.permute.xlu0 %402 }
 0x2e3   :  { %v412_v55 = vmul.f32 %v403_v49, %v384_v48  ;;  %v410_v59 = vmul.f32 %v403_v49, %v382_v51 }
 0x2e4   :  { %v566_v11 = vld [vmem:[#allocation3 + $0x20] sm:$0xff] }
 0x2e5   :  { %vm574_vm12 = vcmp.le.f32.partialorder %v566_v11, 0.0 }
 0x2e6   :  { %v582_v26 = vsel %vm574_vm12, 1.0, %v566_v11 }
 0x2e7   :  { %910 = vrcp.f32 %v582_v26 }
 0x2ea   :  { %v353_v29 = vpop.xlane.xlu1 %352 }
 0x2eb   :  { %v365_v31 = vadd.f32 %v353_v29, %v333_v28 }
 0x2ed   :  { %374 = vst.msk [vmem:[#allocation3 + $0x28] sm:$0xff] %vm42_vm2, %v365_v31  ;;  %v832_v35 = vpop.f32.mrb[0].mxu0 }
 0x2ee   :  { %v541_v38 = vadd.f32 %v832_v35, %v407_v32  ;;  %v463_v39 = vpop.f32.mrb[1].mxu0 }
 0x2ef   :  { %v539_v41 = vadd.f32 %v463_v39, %v405_v34  ;;  %v833_v42 = vpop.f32.mrb[2].mxu0 }
 0x2f0   :  { %549 = vst.msk [vmem:[#allocation4 + $0x10] sm:$0xff] %vm55_vm0, %v541_v38  ;;  %v542_v43 = vadd.f32 %v833_v42, %v408_v36  ;;  %v466_v37 = vpop.f32.mrb[3].mxu0 }
 0x2f1   :  { %v911_v44 = vpop.eup %910  ;;  %547 = vst.msk [vmem:[#allocation4] sm:$0xff] %vm55_vm0, %v539_v41  ;;  %v540_v46 = vadd.f32 %v466_v37, %v406_v40 }
 0x2f2   :  { %550 = vst.msk [vmem:[#allocation4 + $0x18] sm:$0xff] %vm55_vm0, %v542_v43  ;;  %624 = vperm.xlu1 %861, %v911_v44   ;;  %v799_v44 = vld [vmem:[%s1215_s5] ss:$0 sm:$0xff] }
 0x2f3   :  { %548 = vst.msk [vmem:[#allocation4 + $0x8] sm:$0xff] %vm55_vm0, %v540_v46 }
 0x2f4   :  { %v567_v52 = vld [vmem:[#allocation3 + $0x28] sm:$0xff] }
 0x2f5   :  { %v838_v54 = vpop.f32.mrb[8].mxu1  ;;  %vm575_vm2 = vcmp.le.f32.partialorder %v567_v52, 0.0 }
 0x2f6   :  { %v545_v56 = vadd.f32 %v838_v54, %v411_v50  ;;  %v524_v57 = vpop.f32.mrb[9].mxu1  ;;  %v583_v58 = vsel %vm575_vm2, 1.0, %v567_v52 }
 0x2f7   :  { %v543_v60 = vadd.f32 %v524_v57, %v409_v53  ;;  %v839_v61 = vpop.f32.mrb[10].mxu1  ;;  %912 = vrcp.f32 %v583_v58  ;;  %v588_v6 = vld [vmem:[#allocation4 + $0x10] sm:$0xff] }
 0x2f8   :  { %553 = vst.msk [vmem:[#allocation4 + $0x30] sm:$0xff] %vm55_vm0, %v545_v56  ;;  %v546_v62 = vadd.f32 %v839_v61, %v412_v55  ;;  %v527_v63 = vpop.f32.mrb[11].mxu1  ;;  %v586_v23 = vld [vmem:[#allocation4] sm:$0xff] }
 0x2f9   :  { %551 = vst.msk [vmem:[#allocation4 + $0x20] sm:$0xff] %vm55_vm0, %v543_v60  ;;  %v544_v0 = vadd.f32 %v527_v63, %v410_v59  ;;  %v589_v7 = vld [vmem:[#allocation4 + $0x18] sm:$0xff] }
 0x2fa   :  { %554 = vst.msk [vmem:[#allocation4 + $0x38] sm:$0xff] %vm55_vm0, %v546_v62  ;;  %v587_v24 = vld [vmem:[#allocation4 + $0x8] sm:$0xff] }
 0x2fb   :  { %552 = vst.msk [vmem:[#allocation4 + $0x28] sm:$0xff] %vm55_vm0, %v544_v0 }
 0x2ff   :  { %v592_v16 = vld [vmem:[#allocation4 + $0x30] sm:$0xff] }
 0x300   :  { %v590_v34 = vld [vmem:[#allocation4 + $0x20] sm:$0xff] }
 0x301   :  { %v913_v1 = vpop.eup %912  ;;  %v593_v17 = vld [vmem:[#allocation4 + $0x38] sm:$0xff] }
 0x302   :  { %629 = vperm.xlu0 %860, %v913_v1   ;;  %v591_v35 = vld [vmem:[#allocation4 + $0x28] sm:$0xff] }
 0x338   :  { %v615_v5 = vpop.permute.xlu1 %614 }
 0x339   :  { %v644_v9 = vmul.f32 %v615_v5, %v588_v6 }
 0x33c   :  { %v620_v8 = vpop.permute.xlu0 %619 }
 0x33d   :  { %v645_v10 = vmul.f32 %v620_v8, %v589_v7 }
 0x33f   :  { %v862_v12 = vpack.i.bf16 %v645_v10, %v644_v9 }
 0x341   :  { %863 = vrot.lane.b32.xlu1 %v862_v12, %s945_s27 }
 0x344   :  { %v635_v14 = vpop.permute.xlu1 %634 }
 0x345   :  { %v648_v15 = vmul.f32 %v635_v14, %v592_v16 }
 0x348   :  { %v640_v18 = vpop.permute.xlu0 %639  ;;  %v605_v21 = vpop.permute.xlu1 %604 }
 0x349   :  { %v649_v19 = vmul.f32 %v640_v18, %v593_v17  ;;  %v642_v27 = vmul.f32 %v605_v21, %v586_v23 }
 0x34b   :  { %v867_v20 = vpack.i.bf16 %v649_v19, %v648_v15 }
 0x34c   :  { %v610_v11 = vpop.permute.xlu0 %609 }
 0x34d   :  { %868 = vrot.lane.b32.xlu0 %v867_v20, %s945_s27  ;;  %v643_v28 = vmul.f32 %v610_v11, %v587_v24 }
 0x371   :  { %v625_v22 = vpop.permute.xlu1 %624 }
 0x372   :  { %v646_v38 = vmul.f32 %v625_v22, %v590_v34 }
 0x381   :  { %v630_v33 = vpop.permute.xlu0 %629 }
 0x382   :  { %v647_v39 = vmul.f32 %v630_v33, %v591_v35 }
 0x3b3   :  { %v864_v26 = vpop.permute.xlu1 %863 }
 0x3b4   :  { %v866_v25 = vunpack.i.h.bf16 %v864_v26  ;;  %v865_v29 = vunpack.i.l.bf16 %v864_v26 }
 0x3b6   :  { %v667_v30 = vsel %vm55_vm0, %v643_v28, %v866_v25  ;;  %v666_v31 = vsel %vm55_vm0, %v642_v27, %v865_v29 }
 0x3b7   :  { %v670_v32 = vpack.c.bf16 %v667_v30, %v666_v31 }
 0x3b9   :  { %848 = vmatprep.mubr.msk.bf16.mxu0 %vm704_vm13, %v670_v32 }
 0x3bf   :  { %v869_v36 = vpop.permute.xlu0 %868 }
 0x3c0   :  { %v871_v40 = vunpack.i.h.bf16 %v869_v36  ;;  %v870_v41 = vunpack.i.l.bf16 %v869_v36 }
 0x3c2   :  { %v669_v42 = vsel %vm55_vm0, %v647_v39, %v871_v40  ;;  %v668_v43 = vsel %vm55_vm0, %v646_v38, %v870_v41 }
 0x3c3   :  { %v671_v37 = vpack.c.bf16 %v669_v42, %v668_v43 }
 0x3c5   :  { %849 = vmatmul.mubr.msk.bf16.vlgmr.msra.gmra.mrb[4].mxu0 %vm704_vm13, %v671_v37 }
 0x498   :  { %v850_v45 = vpop.f32.mrb[4].mxu0 }
 0x499   :  { %v769_v46 = vadd.f32 %v850_v45, %v799_v44  ;;  %v745_v47 = vpop.f32.mrb[5].mxu0 }
 0x49a   :  { %v767_v48 = vadd.f32 %v799_v44, %v745_v47  ;;  %v851_v49 = vpop.f32.mrb[6].mxu0 }
 0x49b   :  { %774 = vst.msk [vmem:[%s1216_s6 + $0x10] sm:$0xff] %vm771_vm14, %v769_v46  ;;  %v770_v50 = vadd.f32 %v851_v49, %v799_v44  ;;  %v748_v51 = vpop.f32.mrb[7].mxu0 }
 0x49c   :  { %772 = vst.msk [vmem:[%s1216_s6] sm:$0xff] %vm771_vm14, %v767_v48  ;;  %v768_v52 = vadd.f32 %v799_v44, %v748_v51 }
 0x49d   :  { %775 = vst.msk [vmem:[%s1216_s6 + $0x18] sm:$0xff] %vm771_vm14, %v770_v50 }
 0x49e   :  { %773 = vst.msk [vmem:[%s1216_s6 + $0x8] sm:$0xff] %vm771_vm14, %v768_v52 }
 0x49f   :  { %780 = vsyncpa [#allocation6], 1 }

</bundles_post_ra>
